<compile_context>
chip_gen: v5e
topology: v5e:2x2
jax: 0.10.0
libtpu: 0.0.40
codegen_flags: <defaults>
</compile_context>

<pallas_src>
import functools
import math

import numpy as np
import jax
import jax.numpy as jnp
from jax.experimental import pallas as pl
from jax.experimental.pallas import tpu as pltpu


# ---------------------------------------------------------------------------
# helpers
# ---------------------------------------------------------------------------
def _round_up(x, m):
    return (x + m - 1) // m * m


@functools.lru_cache(maxsize=1)
def _vmem_cap_bytes():
    try:
        return int(pltpu.get_tpu_info().vmem_capacity_bytes)
    except Exception:
        return 64 << 20  # conservative (v7x-sized) fallback


@functools.lru_cache(maxsize=1)
def _default_tile_rows():
    # 512-row tiles on 128-MiB VMEM parts (v5e/v6e), 256 on 64-MiB parts (v7x).
    return 512 if _vmem_cap_bytes() >= (96 << 20) else 256


def _vmem_limit_bytes(block_bytes):
    cap = _vmem_cap_bytes()
    hi = int(cap * 0.8)                 # leave headroom for compiler scratch / semaphores
    lo = min(32 << 20, hi)
    est = 2 * int(block_bytes) + (16 << 20)
    return int(min(max(est, lo), hi))


def _row_plan(m, dtype, tile_rows):
    """Pick a row tile aligned to the dtype's sublane packing.

    Returns (tm, m_pad, grid).  Padding only happens when m is smaller than one
    aligned tile AND not aligned itself; otherwise the last block is ragged and
    handled by Pallas (all row kernels here are purely row-local)."""
    itemsize = jnp.dtype(dtype).itemsize
    align = max(8, 32 // max(itemsize, 1))          # 8 f32, 16 bf16, 32 int8/fp8
    tile_rows = max(_round_up(tile_rows, align), align)
    if m > tile_rows:
        tm = tile_rows
    elif m >= 2 * align:
        tm = _round_up(pl.cdiv(m, 2), align)        # >=2 grid steps keeps both v7x TCs busy
    else:
        tm = _round_up(m, align)
    if tm > m:
        m_pad = _round_up(m, align)
        tm = m_pad
    else:
        m_pad = m
    return tm, m_pad, pl.cdiv(m_pad, tm)


def _pad_rows(a, m_pad):
    m = a.shape[0]
    if m_pad == m:
        return a
    return jnp.pad(a, ((0, m_pad - m), (0, 0)))


def _layer_norm_f32(y, gamma, beta, eps):
    # single-pass statistics (sum + sum of squares) -> half the XLU reductions
    n = y.shape[-1]
    inv_n = 1.0 / float(n)
    s1 = jnp.sum(y, axis=-1, keepdims=True)
    s2 = jnp.sum(y * y, axis=-1, keepdims=True)
    mean = s1 * inv_n
    var = jnp.maximum(s2 * inv_n - mean * mean, 0.0)
    return (y - mean) * jax.lax.rsqrt(var + eps) * gamma + beta


# ---------------------------------------------------------------------------
# kernels
# ---------------------------------------------------------------------------
def _qkv_kernel(x_ref, w_ref, b_ref, q_ref, k_ref, v_ref, *, d_model):
    acc = jnp.dot(x_ref[...], w_ref[...], preferred_element_type=jnp.float32)
    acc = acc + b_ref[...].astype(jnp.float32)
    q_ref[...] = acc[:, 0:d_model].astype(q_ref.dtype)
    k_ref[...] = acc[:, d_model:2 * d_model].astype(k_ref.dtype)
    v_ref[...] = acc[:, 2 * d_model:3 * d_model].astype(v_ref.dtype)


def _mha_flash_kernel(q_ref, k_ref, v_ref, o_ref, m_sc, l_sc, acc_sc, *,
                      head_slices, seq_len, kv_block, mask_kv):
    ki = pl.program_id(2)

    @pl.when(ki == 0)
    def _():
        m_sc[...] = jnp.full(m_sc.shape, -jnp.inf, m_sc.dtype)
        l_sc[...] = jnp.zeros(l_sc.shape, l_sc.dtype)
        acc_sc[...] = jnp.zeros(acc_sc.shape, acc_sc.dtype)

    q = q_ref[0]                                    # (tq, D)
    k = k_ref[0]                                    # (tk, D)
    v = v_ref[0]                                    # (tk, D)
    m_prev = m_sc[...]                              # (tq, H)
    l_prev = l_sc[...]                              # (tq, H)
    acc_prev = acc_sc[...]                          # (tq, D)
    tq = q.shape[0]
    tk = k.shape[0]

    if mask_kv:                                     # only traced when T % tk != 0
        kv_pos = ki * kv_block + jax.lax.broadcasted_iota(jnp.int32, (tq, tk), 1)
        kv_valid = kv_pos < seq_len
        row_pos = ki * kv_block + jax.lax.broadcasted_iota(jnp.int32, (tk, 1), 0)
        v = jnp.where(row_pos < seq_len, v, jnp.zeros_like(v))

    m_cols, l_cols, alpha_cols, pv_cols = [], [], [], []
    for h, (start, dim) in enumerate(head_slices):  # static unrolled head loop
        scale = 1.0 / math.sqrt(float(dim))
        q_h = q[:, start:start + dim]
        k_h = k[:, start:start + dim]
        v_h = v[:, start:start + dim]
        s = jax.lax.dot_general(q_h, k_h, (((1,), (1,)), ((), ())),
                                preferred_element_type=jnp.float32) * scale   # (tq, tk) f32
        if mask_kv:
            s = jnp.where(kv_valid, s, -1e30)
        m_p = m_prev[:, h:h + 1]
        m_n = jnp.maximum(m_p, jnp.max(s, axis=-1, keepdims=True))
        alpha = jnp.exp(m_p - m_n)
        p = jnp.exp(s - m_n)                        # unnormalized; normalization deferred
        l_n = alpha * l_prev[:, h:h + 1] + jnp.sum(p, axis=-1, keepdims=True)
        pv = jnp.dot(p.astype(v_h.dtype), v_h, preferred_element_type=jnp.float32)
        m_cols.append(m_n)
        l_cols.append(l_n)
        alpha_cols.append(jnp.broadcast_to(alpha, (tq, dim)))
        pv_cols.append(pv)

    m_sc[...] = jnp.concatenate(m_cols, axis=-1)
    l_sc[...] = jnp.concatenate(l_cols, axis=-1)
    acc_sc[...] = jnp.concatenate(alpha_cols, axis=-1) * acc_prev + \
        jnp.concatenate(pv_cols, axis=-1)

    @pl.when(ki == pl.num_programs(2) - 1)
    def _():
        l = l_sc[...]
        inv = 1.0 / l                               # exact; pl.reciprocal(approx=True) if tol allows
        inv_cols = [jnp.broadcast_to(inv[:, h:h + 1], (l.shape[0], dim))
                    for h, (_, dim) in enumerate(head_slices)]
        o_ref[0] = (acc_sc[...] * jnp.concatenate(inv_cols, axis=-1)).astype(o_ref.dtype)


def _linear_res_ln_kernel(x_ref, res_ref, w_ref, b_ref, g_ref, be_ref, o_ref, *, eps):
    y = jnp.dot(x_ref[...], w_ref[...], preferred_element_type=jnp.float32)
    y = y + b_ref[...].astype(jnp.float32) + res_ref[...].astype(jnp.float32)
    out = _layer_norm_f32(y, g_ref[...].astype(jnp.float32),
                          be_ref[...].astype(jnp.float32), eps)
    o_ref[...] = out.astype(o_ref.dtype)


def _ffn_ln2_kernel(x_ref, w1_ref, b1_ref, w2_ref, b2_ref,
                    gf_ref, bf_ref, g2_ref, be2_ref, o_ref, *, eps):
    x = x_ref[...]
    xf = x.astype(jnp.float32)
    h = jnp.dot(x, w1_ref[...], preferred_element_type=jnp.float32)
    h = h + b1_ref[...].astype(jnp.float32)
    # exact GELU (erf form) matching torch.nn.GELU() default; dropout -> identity (eval)
    h = 0.5 * h * (1.0 + jax.lax.erf(h * 0.7071067811865476))
    y = jnp.dot(h.astype(w2_ref.dtype), w2_ref[...], preferred_element_type=jnp.float32)
    y = y + b2_ref[...].astype(jnp.float32) + xf
    ff = _layer_norm_f32(y, gf_ref[...].astype(jnp.float32),
                         bf_ref[...].astype(jnp.float32), eps)     # FeedForward's LayerNorm
    out = _layer_norm_f32(xf + ff, g2_ref[...].astype(jnp.float32),
                          be2_ref[...].astype(jnp.float32), eps)   # EncoderLayer LN2 (fused)
    o_ref[...] = out.astype(o_ref.dtype)


# ---------------------------------------------------------------------------
# pallas_call wrappers
# ---------------------------------------------------------------------------
def qkv_proj_pallas(x2, w, b, *, tile_rows):
    m, d_in = x2.shape
    d3 = w.shape[1]
    d = d3 // 3
    tm, m_pad, grid = _row_plan(m, x2.dtype, tile_rows)
    xp = _pad_rows(x2, m_pad)
    itemsize = jnp.dtype(x2.dtype).itemsize
    block_bytes = (tm * d_in + d_in * d3 + d3 + 3 * tm * d) * itemsize
    cost = pl.CostEstimate(
        flops=int(2 * m * d_in * d3), transcendentals=0,
        bytes_accessed=int((m * d_in + d_in * d3 + d3 + 3 * m * d) * itemsize))
    outs = pl.pallas_call(
        functools.partial(_qkv_kernel, d_model=d),
        out_shape=(jax.ShapeDtypeStruct((m_pad, d), x2.dtype),
                   jax.ShapeDtypeStruct((m_pad, d), x2.dtype),
                   jax.ShapeDtypeStruct((m_pad, d), x2.dtype)),
        grid=(grid,),
        in_specs=[pl.BlockSpec((tm, d_in), lambda i: (i, 0)),
                  pl.BlockSpec((d_in, d3), lambda i: (0, 0)),
                  pl.BlockSpec((1, d3), lambda i: (0, 0))],
        out_specs=(pl.BlockSpec((tm, d), lambda i: (i, 0)),
                   pl.BlockSpec((tm, d), lambda i: (i, 0)),
                   pl.BlockSpec((tm, d), lambda i: (i, 0))),
        compiler_params=pltpu.CompilerParams(
            dimension_semantics=("parallel",),
            vmem_limit_bytes=_vmem_limit_bytes(block_bytes)),
        cost_estimate=cost,
    )(xp, w, b.reshape(1, d3))
    q, k, v = outs
    if m_pad != m:
        q, k, v = q[:m], k[:m], v[:m]
    return q, k, v


def mha_flash_pallas(q, k, v, head_slices, *, tq_cap=256, tk_cap=512):
    B, T, D = q.shape
    num_heads = len(head_slices)
    tq = min(_round_up(tq_cap, 8), _round_up(T, 8))
    tk = min(_round_up(tk_cap, 8), _round_up(T, 8))
    nq = pl.cdiv(T, tq)
    nk = pl.cdiv(T, tk)
    mask_kv = (T % tk) != 0
    itemsize = jnp.dtype(q.dtype).itemsize
    block_bytes = (2 * tq * D + 2 * tk * D) * itemsize + tq * (2 * num_heads + D) * 4
    cost = pl.CostEstimate(
        flops=int(4 * B * T * T * D),
        transcendentals=int(B * num_heads * T * T),
        bytes_accessed=int(4 * B * T * D * itemsize))
    return pl.pallas_call(
        functools.partial(_mha_flash_kernel, head_slices=tuple(head_slices),
                          seq_len=T, kv_block=tk, mask_kv=mask_kv),
        out_shape=jax.ShapeDtypeStruct((B, T, D), q.dtype),
        grid=(B, nq, nk),
        in_specs=[pl.BlockSpec((1, tq, D), lambda b, qi, ki: (b, qi, 0)),
                  pl.BlockSpec((1, tk, D), lambda b, qi, ki: (b, ki, 0)),
                  pl.BlockSpec((1, tk, D), lambda b, qi, ki: (b, ki, 0))],
        out_specs=pl.BlockSpec((1, tq, D), lambda b, qi, ki: (b, qi, 0)),
        scratch_shapes=[pltpu.VMEM((tq, num_heads), jnp.float32),
                        pltpu.VMEM((tq, num_heads), jnp.float32),
                        pltpu.VMEM((tq, D), jnp.float32)],
        compiler_params=pltpu.CompilerParams(
            dimension_semantics=("parallel", "parallel", "arbitrary"),
            vmem_limit_bytes=_vmem_limit_bytes(block_bytes)),
        cost_estimate=cost,
    )(q, k, v)


def linear_res_ln_pallas(x2, res2, w, b, gamma, beta, *, eps, tile_rows):
    m, d_in = x2.shape
    d_out = w.shape[1]
    tm, m_pad, grid = _row_plan(m, x2.dtype, tile_rows)
    xp = _pad_rows(x2, m_pad)
    rp = _pad_rows(res2, m_pad)
    itemsize = jnp.dtype(x2.dtype).itemsize
    block_bytes = (tm * d_in + tm * d_out + d_in * d_out + 3 * d_out + tm * d_out) * itemsize
    cost = pl.CostEstimate(
        flops=int(2 * m * d_in * d_out), transcendentals=0,
        bytes_accessed=int((2 * m * d_in + d_in * d_out + 3 * d_out + m * d_out) * itemsize))
    out = pl.pallas_call(
        functools.partial(_linear_res_ln_kernel, eps=eps),
        out_shape=jax.ShapeDtypeStruct((m_pad, d_out), x2.dtype),
        grid=(grid,),
        in_specs=[pl.BlockSpec((tm, d_in), lambda i: (i, 0)),
                  pl.BlockSpec((tm, d_out), lambda i: (i, 0)),
                  pl.BlockSpec((d_in, d_out), lambda i: (0, 0)),
                  pl.BlockSpec((1, d_out), lambda i: (0, 0)),
                  pl.BlockSpec((1, d_out), lambda i: (0, 0)),
                  pl.BlockSpec((1, d_out), lambda i: (0, 0))],
        out_specs=pl.BlockSpec((tm, d_out), lambda i: (i, 0)),
        compiler_params=pltpu.CompilerParams(
            dimension_semantics=("parallel",),
            vmem_limit_bytes=_vmem_limit_bytes(block_bytes)),
        cost_estimate=cost,
    )(xp, rp, w, b.reshape(1, d_out), gamma.reshape(1, d_out), beta.reshape(1, d_out))
    return out[:m] if m_pad != m else out


def ffn_ln2_pallas(x2, w1, b1, w2, b2, gf, bf, g2, be2, *, eps, tile_rows):
    m, d_model = x2.shape
    d_ff = w1.shape[1]
    tm, m_pad, grid = _row_plan(m, x2.dtype, tile_rows)
    xp = _pad_rows(x2, m_pad)
    itemsize = jnp.dtype(x2.dtype).itemsize
    block_bytes = (tm * d_model + 2 * d_model * d_ff + d_ff + 5 * d_model
                   + tm * d_model + 4 * tm * d_ff) * itemsize
    cost = pl.CostEstimate(
        flops=int(4 * m * d_model * d_ff),
        transcendentals=int(m * d_ff),
        bytes_accessed=int((2 * m * d_model + 2 * d_model * d_ff + d_ff
                            + 5 * d_model) * itemsize))
    out = pl.pallas_call(
        functools.partial(_ffn_ln2_kernel, eps=eps),
        out_shape=jax.ShapeDtypeStruct((m_pad, d_model), x2.dtype),
        grid=(grid,),
        in_specs=[pl.BlockSpec((tm, d_model), lambda i: (i, 0)),
                  pl.BlockSpec((d_model, d_ff), lambda i: (0, 0)),
                  pl.BlockSpec((1, d_ff), lambda i: (0, 0)),
                  pl.BlockSpec((d_ff, d_model), lambda i: (0, 0)),
                  pl.BlockSpec((1, d_model), lambda i: (0, 0)),
                  pl.BlockSpec((1, d_model), lambda i: (0, 0)),
                  pl.BlockSpec((1, d_model), lambda i: (0, 0)),
                  pl.BlockSpec((1, d_model), lambda i: (0, 0)),
                  pl.BlockSpec((1, d_model), lambda i: (0, 0))],
        out_specs=pl.BlockSpec((tm, d_model), lambda i: (i, 0)),
        compiler_params=pltpu.CompilerParams(
            dimension_semantics=("parallel",),
            vmem_limit_bytes=_vmem_limit_bytes(block_bytes)),
        cost_estimate=cost,
    )(xp, w1, b1.reshape(1, d_ff), w2, b2.reshape(1, d_model),
      gf.reshape(1, d_model), bf.reshape(1, d_model),
      g2.reshape(1, d_model), be2.reshape(1, d_model))
    return out[:m] if m_pad != m else out


# ---------------------------------------------------------------------------
# head-dim bookkeeping (host-side, matches torch _compute_integer_dims)
# ---------------------------------------------------------------------------
def _compute_head_dims(head_weight_logits, d_model, num_heads, min_dim):
    logits = np.asarray(head_weight_logits, dtype=np.float32)
    e = np.exp(logits - logits.max())
    ratios = e / e.sum()
    head_dims_float = min_dim + ratios * (d_model - min_dim * num_heads)
    head_dims_int = np.floor(head_dims_float).astype(np.int64)
    diff = int(d_model - head_dims_int.sum())
    residuals = head_dims_float - np.floor(head_dims_float)
    if diff > 0:
        idx = np.argsort(-residuals)[:diff]
        head_dims_int[idx] += 1
    elif diff < 0:
        idx = np.argsort(residuals)[:(-diff)]
        head_dims_int[idx] -= 1
    return head_dims_float, head_dims_int


def _head_slices(head_dims_int, d_model):
    slices, start = [], 0
    for dim in head_dims_int.tolist():
        slices.append((start, int(dim)))
        start += int(dim)
    assert start == d_model, "head dims must partition d_model"
    return tuple(slices)


def _aux_loss(head_weight_logits, head_dims_int, d_model, num_heads, min_dim):
    ratios = jax.nn.softmax(head_weight_logits.astype(jnp.float32))
    hdf = min_dim + ratios * (d_model - min_dim * num_heads)
    hdi = jnp.asarray(head_dims_int, jnp.float32)
    float_loss = (hdf.sum() - d_model) ** 2 + jnp.mean(jax.nn.relu(min_dim - hdf))
    int_loss = jnp.mean((hdf - hdi) ** 2)
    return float_loss + 0.5 * int_loss


# ---------------------------------------------------------------------------
# full encoder layer forward
# ---------------------------------------------------------------------------
def encoder_layer_pallas(x, params, *, num_heads, min_dim, eps=1e-5, tile_rows=None):
    if tile_rows is None:
        tile_rows = _default_tile_rows()
    B, T, D = x.shape
    m = B * T
    x2 = x.reshape(m, D)

    _, head_dims_int = _compute_head_dims(
        np.asarray(params["head_weight_logits"]), D, num_heads, min_dim)
    head_slices = _head_slices(head_dims_int, D)

    # --- multi-head attention ---
    q2, k2, v2 = qkv_proj_pallas(x2, params["w_qkv"], params["b_qkv"], tile_rows=tile_rows)
    ctx = mha_flash_pallas(q2.reshape(B, T, D), k2.reshape(B, T, D), v2.reshape(B, T, D),
                           head_slices)
    ctx2 = ctx.reshape(m, D)

    # out_proj + dropout(identity) + residual + LayerNorm1 (fused)
    x1 = linear_res_ln_pallas(ctx2, x2, params["w_out"], params["b_out"],
                              params["ln1_g"], params["ln1_b"],
                              eps=eps, tile_rows=tile_rows)

    # fc1 -> exact GELU -> fc2 -> +x1 -> LN_ff -> +x1 -> LN2  (single fused kernel)
    out2 = ffn_ln2_pallas(x1, params["w1"], params["b1"], params["w2"], params["b2"],
                          params["lnf_g"], params["lnf_b"],
                          params["ln2_g"], params["ln2_b"],
                          eps=eps, tile_rows=tile_rows)

    loss = _aux_loss(params["head_weight_logits"], head_dims_int, D, num_heads, min_dim)
    return out2.reshape(B, T, D), loss


# ---------------------------------------------------------------------------
# plain-JAX reference (mirrors the PyTorch forward)
# ---------------------------------------------------------------------------
def _ln_ref(y, gamma, beta, eps):
    mean = jnp.mean(y, axis=-1, keepdims=True)
    var = jnp.mean((y - mean) ** 2, axis=-1, keepdims=True)
    return (y - mean) / jnp.sqrt(var + eps) * gamma + beta


def _reference_encoder_layer(x, params, *, num_heads, min_dim, eps=1e-5):
    B, T, D = x.shape
    _, head_dims_int = _compute_head_dims(
        np.asarray(params["head_weight_logits"]), D, num_heads, min_dim)
    qkv = x @ params["w_qkv"] + params["b_qkv"]
    q_all, k_all, v_all = jnp.split(qkv, 3, axis=-1)
    outs, start = [], 0
    for h in range(num_heads):
        dim = int(head_dims_int[h])
        q = q_all[..., start:start + dim]
        k = k_all[..., start:start + dim]
        v = v_all[..., start:start + dim]
        start += dim
        s = jnp.einsum("btd,bsd->bts", q, k) / (dim ** 0.5)
        outs.append(jnp.einsum("bts,bsd->btd", jax.nn.softmax(s, axis=-1), v))
    attn_out = jnp.concatenate(outs, axis=-1) @ params["w_out"] + params["b_out"]
    x1 = _ln_ref(x + attn_out, params["ln1_g"], params["ln1_b"], eps)
    h = jax.nn.gelu(x1 @ params["w1"] + params["b1"], approximate=False)
    ff = _ln_ref(h @ params["w2"] + params["b2"] + x1,
                 params["lnf_g"], params["lnf_b"], eps)
    out = _ln_ref(x1 + ff, params["ln2_g"], params["ln2_b"], eps)
    loss = _aux_loss(params["head_weight_logits"], head_dims_int, D, num_heads, min_dim)
    return out, loss


# ---------------------------------------------------------------------------
# demo / self-test
# ---------------------------------------------------------------------------
if __name__ == "__main__":
    batch, seq, d_model, num_heads, d_ff, min_dim = 2, 8, 32, 4, 64, 4

    key = jax.random.PRNGKey(0)
    ks = jax.random.split(key, 12)
    x = jax.random.normal(ks[0], (batch, seq, d_model), jnp.float32)

    def uinit(k, shape, fan_in):
        bound = 1.0 / (fan_in ** 0.5)
        return jax.random.uniform(k, shape, jnp.float32, -bound, bound)

    params = {
        "head_weight_logits": jax.random.normal(ks[1], (num_heads,), jnp.float32),
        "w_qkv": uinit(ks[2], (d_model, 3 * d_model), d_model),
        "b_qkv": uinit(ks[3], (3 * d_model,), d_model),
        "w_out": uinit(ks[4], (d_model, d_model), d_model),
        "b_out": uinit(ks[5], (d_model,), d_model),
        "w1": uinit(ks[6], (d_model, d_ff), d_model),
        "b1": uinit(ks[7], (d_ff,), d_model),
        "w2": uinit(ks[8], (d_ff, d_model), d_ff),
        "b2": uinit(ks[9], (d_model,), d_ff),
        "ln1_g": jnp.ones((d_model,), jnp.float32),
        "ln1_b": jnp.zeros((d_model,), jnp.float32),
        "ln2_g": jnp.ones((d_model,), jnp.float32),
        "ln2_b": jnp.zeros((d_model,), jnp.float32),
        "lnf_g": jnp.ones((d_model,), jnp.float32),
        "lnf_b": jnp.zeros((d_model,), jnp.float32),
    }

    out, loss = encoder_layer_pallas(x, params, num_heads=num_heads, min_dim=min_dim)
    out = jax.block_until_ready(out)
    loss = jax.block_until_ready(loss)

    ref_out, ref_loss = _reference_encoder_layer(x, params, num_heads=num_heads,
                                                 min_dim=min_dim)
    assert out.shape == (batch, seq, d_model)
    max_err = float(jnp.max(jnp.abs(out - ref_out)))
    assert jnp.allclose(out, ref_out, atol=1e-4, rtol=1e-4), f"max abs err {max_err}"
    assert jnp.allclose(loss, ref_loss, atol=1e-5, rtol=1e-5), \
        f"loss mismatch {float(loss)} vs {float(ref_loss)}"

    print("KERNEL_OK")
</pallas_src>

<mosaic_0001>
module attributes {stable_mosaic.version = 11 : i64} {
  func.func @_qkv_kernel(%arg0: i32, %arg1: memref<8x32xf32, #tpu.memory_space<vmem>>, %arg2: memref<32x96xf32, #tpu.memory_space<vmem>>, %arg3: memref<1x96xf32, #tpu.memory_space<vmem>>, %arg4: memref<8x32xf32, #tpu.memory_space<vmem>>, %arg5: memref<8x32xf32, #tpu.memory_space<vmem>>, %arg6: memref<8x32xf32, #tpu.memory_space<vmem>>) attributes {dimension_semantics = [#tpu.dimension_semantics<parallel>], iteration_bounds = array<i64: 2>, scalar_prefetch = 0 : i64, scratch_operands = 0 : i64, tpu.core_type = #tpu.core_type<tc>, window_params = [{transform_indices = @transform_0, window_bounds = array<i64: 8, 32>}, {pipeline_mode = #tpu.pipeline_mode<synchronous>, transform_indices = @transform_1, window_bounds = array<i64: 32, 96>}, {pipeline_mode = #tpu.pipeline_mode<synchronous>, transform_indices = @transform_2, window_bounds = array<i64: 1, 96>}, {transform_indices = @transform_3, window_bounds = array<i64: 8, 32>}, {transform_indices = @transform_4, window_bounds = array<i64: 8, 32>}, {transform_indices = @transform_5, window_bounds = array<i64: 8, 32>}]} {
    %c0 = arith.constant 0 : index
    %c0_0 = arith.constant 0 : index
    %0 = vector.load %arg1[%c0, %c0_0] : memref<8x32xf32, #tpu.memory_space<vmem>>, vector<8x32xf32>
    %c0_1 = arith.constant 0 : index
    %c0_2 = arith.constant 0 : index
    %1 = vector.load %arg2[%c0_1, %c0_2] : memref<32x96xf32, #tpu.memory_space<vmem>>, vector<32x96xf32>
    %cst = arith.constant dense<0.000000e+00> : vector<8x96xf32>
    %2 = tpu.matmul %0, %1, %cst {dimension_numbers = #tpu.dot_dimension_numbers<[1], [0], [0], [1], [0, 0, 1, 1], [], []>} : vector<8x32xf32>, vector<32x96xf32>, vector<8x96xf32> -> vector<8x96xf32>
    %c0_3 = arith.constant 0 : index
    %c0_4 = arith.constant 0 : index
    %3 = vector.load %arg3[%c0_3, %c0_4] : memref<1x96xf32, #tpu.memory_space<vmem>>, vector<1x96xf32>
    %4 = vector.broadcast %3 : vector<1x96xf32> to vector<8x96xf32>
    %5 = arith.addf %2, %4 : vector<8x96xf32>
    %6 = vector.extract_strided_slice %5 {offsets = [0, 0], sizes = [8, 32], strides = [1, 1]} : vector<8x96xf32> to vector<8x32xf32>
    %c0_5 = arith.constant 0 : index
    %c0_6 = arith.constant 0 : index
    %7 = vector.load %arg4[%c0_5, %c0_6] : memref<8x32xf32, #tpu.memory_space<vmem>>, vector<8x32xf32>
    tpu.vector_store %arg4[%c0_5, %c0_6], %6 {strides = array<i32>} : memref<8x32xf32, #tpu.memory_space<vmem>>, vector<8x32xf32>,
    %8 = vector.extract_strided_slice %5 {offsets = [0, 32], sizes = [8, 32], strides = [1, 1]} : vector<8x96xf32> to vector<8x32xf32>
    %c0_7 = arith.constant 0 : index
    %c0_8 = arith.constant 0 : index
    %9 = vector.load %arg5[%c0_7, %c0_8] : memref<8x32xf32, #tpu.memory_space<vmem>>, vector<8x32xf32>
    tpu.vector_store %arg5[%c0_7, %c0_8], %8 {strides = array<i32>} : memref<8x32xf32, #tpu.memory_space<vmem>>, vector<8x32xf32>,
    %10 = vector.extract_strided_slice %5 {offsets = [0, 64], sizes = [8, 32], strides = [1, 1]} : vector<8x96xf32> to vector<8x32xf32>
    %c0_9 = arith.constant 0 : index
    %c0_10 = arith.constant 0 : index
    %11 = vector.load %arg6[%c0_9, %c0_10] : memref<8x32xf32, #tpu.memory_space<vmem>>, vector<8x32xf32>
    tpu.vector_store %arg6[%c0_9, %c0_10], %10 {strides = array<i32>} : memref<8x32xf32, #tpu.memory_space<vmem>>, vector<8x32xf32>,
    return
  }
  func.func @transform_0(%arg0: i32) -> (i32, i32) {
    %c0_i32 = arith.constant 0 : i32
    %c0_i32_0 = arith.constant 0 : i32
    return %arg0, %c0_i32 : i32, i32
  }
  func.func @transform_1(%arg0: i32) -> (i32, i32) {
    %c0_i32 = arith.constant 0 : i32
    %c0_i32_0 = arith.constant 0 : i32
    %c0_i32_1 = arith.constant 0 : i32
    return %c0_i32, %c0_i32_0 : i32, i32
  }
  func.func @transform_2(%arg0: i32) -> (i32, i32) {
    %c0_i32 = arith.constant 0 : i32
    %c0_i32_0 = arith.constant 0 : i32
    %c0_i32_1 = arith.constant 0 : i32
    return %c0_i32, %c0_i32_0 : i32, i32
  }
  func.func @transform_3(%arg0: i32) -> (i32, i32) {
    %c0_i32 = arith.constant 0 : i32
    %c0_i32_0 = arith.constant 0 : i32
    return %arg0, %c0_i32 : i32, i32
  }
  func.func @transform_4(%arg0: i32) -> (i32, i32) {
    %c0_i32 = arith.constant 0 : i32
    %c0_i32_0 = arith.constant 0 : i32
    return %arg0, %c0_i32 : i32, i32
  }
  func.func @transform_5(%arg0: i32) -> (i32, i32) {
    %c0_i32 = arith.constant 0 : i32
    %c0_i32_0 = arith.constant 0 : i32
    return %arg0, %c0_i32 : i32, i32
  }
}

</mosaic_0001>

<bundles_post_ra>
// kernel: tpu_custom_call.1
= control target key start
LH: loop header
LB: loop body
LE: loop exit
PB: predicated region body
PF: predicated region fallthrough
CT: control target
= control target key end

     0   :  { %11 = vsyncpa [#allocation3], 0  ;;  %s1026_s0 = inlined_call_operand.hbm [shape: f32[16,32], index: 0, kind: input, shape index: {}]   ;;  %s1027_s1 = inlined_call_operand.hbm [shape: f32[32,96], index: 1, kind: input, shape index: {}]   ;;  %s1028_s2 = inlined_call_operand.vmem [shape: f32[1,96], index: 2, kind: input, shape index: {}]   ;;  %s1029_s3 = inlined_call_operand.hbm [shape: f32[16,32], index: 3, kind: output, shape index: {0}]   ;;  %s1030_s4 = inlined_call_operand.hbm [shape: f32[16,32], index: 4, kind: output, shape index: {1}]   ;;  %s1031_s5 = inlined_call_operand.hbm [shape: f32[16,32], index: 5, kind: output, shape index: {2}]  }
   0x1   :  { %13 = vsyncpa [#allocation3 + $0x1], 0 }
   0x2   :  { %14 = vsyncpa [#allocation6], 0 }
   0x3   :  { %15 = vsyncpa [#allocation4], 0 }
   0x4   :  { %17 = vsyncpa [#allocation4 + $0x1], 0 }
   0x5   :  { %18 = vsyncpa [#allocation9], 0 }
   0x6   :  { %20 = vsyncpa [#allocation9 + $0x1], 0  ;;  %s837_s18 = smov 0   ;;  %s839_s19 = smov 0  }
   0x7   :  { %s841_s20 = smov 0   ;;  %s843_s21 = smov 0  }
   0x8 LB: > { %s188_s24 = sshll.u32 %s1027_s1, 4  ;;  %s861_s25 = sadd.s32 4294967295, %s800_s21   ;;  %s800_s21 = sphi %s843_s21, %s1043_s21   ;;  %s796_s20 = sphi %s841_s20, %s1042_s20   ;;  %s792_s19 = sphi %s839_s19, %s1041_s19   ;;  %s788_s18 = sphi %s837_s18, %s1040_s18   ;;  %s189_s24 = int_to_ptr.hbm [resolvable:$true] %s188_s24 }
   0x9   : > { %p518_p0 = scmp.ge.s32.totalorder %s800_s21, 1  ;;  %p47_p1 = scmp.eq.s32.totalorder %s861_s25, 0 }
   0xa   : > { %p177_p2 = scmp.lt.s32.totalorder %s800_s21, 3  ;;  %s802_s27 = smov [#allocation5]  }
   0xb   : > { %s190_s28 = sshll.u32 %s802_s27, 4  ;;  %s803_s29 = smov 128   ;;  %s191_s28 = int_to_ptr.vmem [resolvable:$true] %s190_s28 }
   0xc   : > { %p866_p3 = pnand %p518_p0, %p177_p2  ;;  %s804_s30 = smov 8  }
   0xd   : > { %s1032_s6 = sadd.s32 4294967294, %s800_s21   ;;  %s877_s7 = sadd.s32 1, %s800_s21  }
   0xe   : > { %p550_p4 = pneg %p866_p3  ;;  %s33_s8 = sadd.s32 1, %s796_s20 }
   0xf   : > { %s30_s9 = ssub.s32 %s800_s21, %s877_s7  ;;  %p40_p7 = scmp.ne.s32.totalorder %s796_s20, %s792_s19 }
  0x10   : > { %p551_p6 = pnand %p550_p4, %p47_p1  ;;  %p31_p8 = scmp.eq.s32.totalorder %s30_s9, 0 }
  0x11   : > { %p41_p9 = scmp.eq.s32.totalorder %s800_s21, 0  ;;  %p46_p10 = scmp.ne.s32.totalorder %s792_s19, %s788_s18 }
  0x12   : > { %553 = dma.hbm_to_vmem [thread:$0]  (!%p551_p6), %s189_s24, 512, %s191_s28, [#allocation6], %s803_s29, %s803_s29, %s804_s30  }
  0x13   : > { %p112_p11 = scmp.eq.s32.totalorder %s861_s25, 1  ;;  %p893_p12 = por %p47_p1, %p46_p10 }
  0x14   : > { %s889_s10 = scalar_select %p31_p8, %s796_s20, %s33_s8  }
  0x15   : > { %p897_p13 = por %p112_p11, %p40_p7  ;;  %p118_p0 = scmp.eq.s32.totalorder %s1032_s6, 1 }
  0x16   : > { %p42_p2 = por %p41_p9, %p40_p7  ;;  %s207_s13 = sand.u32 1, %s796_s20  }
  0x17   : > { %p904_p4 = por %p118_p0, %p46_p10  ;;  %p569_p6 = scmp.lt.s32.totalorder %s800_s21, 2 }
  0x18   : > { %s521_s15 = sshll.u32 %s207_s13, 3  ;;  %s522_s16 = sshll.u32 %s800_s21, 3 }
  0x19   : > { %s215_s23 = scalar_lea.hbm %s1026_s0, %s522_s16  ;;  %s211_s27 = scalar_lea.vmem [#allocation2], %s521_s15 }
  0x1a   : > { %s217_s24 = sshll.u32 %s215_s23, 4  ;;  %s219_s28 = sshll.u32 %s211_s27, 4  ;;  %s218_s24 = int_to_ptr.hbm [resolvable:$true] %s217_s24  ;;  %s220_s28 = int_to_ptr.vmem [resolvable:$true] %s219_s28 }
  0x1b   : > { %p913_p8 = pnand %p569_p6, %p42_p2  ;;  %s208_s30 = scalar_lea.sflag [#allocation3], %s207_s13 }
  0x1c   : > { %s640_s8 = sshra.s32 %s218_s24, 4  ;;  %s647_s15 = scalar_lea.hbm %s1026_s0, 16  ;;  %s641_s8 = int_to_ptr.hbm [resolvable:$true] %s640_s8 }
  0x1d   : > { %s642_s9 = scalar_lea.hbm %s641_s8, 8  ;;  %p644_p9 = pneg %p913_p8 }
  0x1e   : > { %p643_p7 = scmp.ne.s32.totalorder %s641_s8, %s642_s9  ;;  %p648_p0 = scmp.lt.s32.totalorder %s641_s8, %s1026_s0 }
  0x1f   : > { %p649_p2 = scmp.lt.s32.totalorder %s647_s15, %s642_s9 }
  0x20   : > { %p645_p10 = pnand %p644_p9, %p643_p7 }
  0x21   : > { %p650_p6 = por %p649_p2, %p648_p0 }
  0x22   : > { %p646_p11 = pneg %p645_p10 }
  0x24   : > { %p651_p5 = pnand %p650_p6, %p646_p11 }
  0x26   : > { %654 = shalt.err (!%p651_p5)
}
  0x27   : > { %557 = dma.hbm_to_vmem [thread:$0]  (!%p913_p8), %s218_s24, 128, %s220_s28, %s208_s30  }
  0x28   : > { %228 = sbr.rel (%p866_p3) target bundleno = 315 (0x13b), region = 32  ;;  %s930_s13 = sand.u32 (!%p866_p3), 1, %s792_s19  }
  0x29   : > { %s933_s27 = sshll.u32 (!%p866_p3), %s930_s13, 3  ;;  %s231_s8 = scalar_lea.sflag (!%p866_p3), [#allocation3], %s930_s13 }
  0x2a   : > { %s234_s9 = scalar_lea.vmem (!%p866_p3), [#allocation2], %s933_s27 }
  0x2d   : > { %771 = dma.done.wait (%p893_p12), %s231_s8, 128  }
  0x2e   : > { %773 = vsyncadd (%p893_p12), %s231_s8, 4294967168 }
  0x2f   : > { %775 = dma.done.wait (%p47_p1), [#allocation6], 512  }
  0x30   : > { %777 = vsyncadd (%p47_p1), [#allocation6], 4294966784  ;;  %v281_v0 = vld [vmem:[#allocation5 + $0x18] sm:$0xff]  ;;  %v280_v1 = vld [vmem:[#allocation5 + $0x10] sm:$0xff]  ;;  %vm286_vm0 = vcmask 261120   ;;  %s947_s26 = sshll.u32 %s861_s25, 3 }
  0x31   : > { %302 = vmatpush.msra.mxu0 %v281_v0  ;;  %v279_v2 = vld [vmem:[#allocation5 + $0x8] sm:$0xff]  ;;  %v278_v3 = vld [vmem:[#allocation5] sm:$0xff]  ;;  %v277_v4 = vld [vmem:[%s234_s9] sm:$0xff]  ;;  %s341_s30 = scalar_lea.hbm %s1029_s3, %s947_s26  ;;  %s262_s16 = scalar_lea.vmem [#allocation7], %s933_s27 }
  0x32   : > { %v609_v5 = vld [vmem:[%s1028_s2] ss:$0 sm:$0xff]  ;;  %s343_s17 = sshll.u32 %s262_s16, 4  ;;  %s345_s15 = sshll.u32 %s341_s30, 4  ;;  %s344_s17 = int_to_ptr.vmem [resolvable:$true] %s343_s17  ;;  %s346_s15 = int_to_ptr.hbm [resolvable:$true] %s345_s15 }
  0x33   : > { %303 = vmatpush.msra.mxu0 %v280_v1  ;;  %s805_s22 = smov 96   ;;  %s321_s23 = scalar_lea.sflag [#allocation4], %s930_s13 }
  0x34   : > { %s684_s8 = sshra.s32 %s346_s15, 4  ;;  %s690_s28 = scalar_lea.hbm %s1029_s3, 16  ;;  %s685_s8 = int_to_ptr.hbm [resolvable:$true] %s684_s8 }
  0x35   : > { %304 = vmatpush.msra.mxu0 %v279_v2  ;;  %s686_s9 = scalar_lea.hbm %s685_s8, 8  ;;  %p691_p12 = scmp.lt.s32.totalorder %s685_s8, %s1029_s3 }
  0x36   : > { %p687_p1 = scmp.ne.s32.totalorder %s685_s8, %s686_s9  ;;  %p692_p8 = scmp.lt.s32.totalorder %s690_s28, %s686_s9 }
  0x37   : > { %305 = vmatpush.msra.mxu0 %v278_v3 }
  0x38   : > { %529 = vmatmul.msk.f32.vlgmr.msra.gmra.mxu0 %vm286_vm0, %v277_v4  ;;  %p688_p3 = pnand %p687_p1, %p897_p13  ;;  %p693_p7 = por %p692_p8, %p691_p12 }
  0x3a   : > { %p689_p5 = pneg %p688_p3 }
  0x3c   : > { %p694_p9 = pnand %p693_p7, %p689_p5 }
  0xb5   : > { %v307_v6 = vpop.f32.mrf.mxu0 }
  0xb6   : > { %v308_v7 = vadd.f32 %v609_v5, %v307_v6 }
  0xb8   : > { %312 = vrot.lane.b32.xlu0 %v308_v7, %s805_s22  ;;  %310 = vst.msk [vmem:[%s262_s16] sm:$0xff] %vm286_vm0, %v308_v7 }
  0xb9   : > { %697 = shalt.err (!%p694_p9)
}
  0xba   : > { %544 = dma.vmem_to_hbm [thread:$0]  (%p897_p13), %s344_s17, 128, %s346_s15, %s321_s23  }
  0xbb   : > { %s806_s13 = smov 64   ;;  %s355_s11 = scalar_lea.hbm %s1030_s4, %s947_s26 }
  0xbc   : > { %s325_s24 = sand.u32 1, %s861_s25   ;;  %s269_s8 = scalar_lea.vmem [#allocation8], %s933_s27 }
  0xbd   : > { %s357_s9 = sshll.u32 %s269_s8, 4  ;;  %s359_s28 = sshll.u32 %s355_s11, 4  ;;  %s358_s9 = int_to_ptr.vmem [resolvable:$true] %s357_s9  ;;  %s360_s28 = int_to_ptr.hbm [resolvable:$true] %s359_s28 }
  0xbe   : > { %s369_s17 = scalar_lea.hbm %s1031_s5, %s947_s26  ;;  %s980_s15 = scalar_lea.sflag [#allocation9], %s325_s24 }
  0xbf   : > { %s712_s23 = sshra.s32 %s360_s28, 4  ;;  %s718_s22 = scalar_lea.hbm %s1030_s4, 16  ;;  %s713_s23 = int_to_ptr.hbm [resolvable:$true] %s712_s23 }
  0xc0   : > { %316 = vrot.lane.b32.xlu0 %v308_v7, %s806_s13  ;;  %s714_s13 = scalar_lea.hbm %s713_s23, 8  ;;  %p719_p2 = scmp.lt.s32.totalorder %s713_s23, %s1030_s4 }
  0xc1   : > { %p715_p10 = scmp.ne.s32.totalorder %s713_s23, %s714_s13  ;;  %p720_p6 = scmp.lt.s32.totalorder %s718_s22, %s714_s13 }
  0xc3   : > { %p716_p11 = pnand %p715_p10, %p897_p13  ;;  %p721_p1 = por %p720_p6, %p719_p2 }
  0xc5   : > { %p717_p0 = pneg %p716_p11 }
  0xc7   : > { %p722_p3 = pnand %p721_p1, %p717_p0 }
 0x12a   : > { %v313_v8 = vpop.permute.xlu0 %312 }
 0x12b   : > { %315 = vst.msk [vmem:[%s269_s8] sm:$0xff] %vm286_vm0, %v313_v8 }
 0x12c   : > { %725 = shalt.err (!%p722_p3)
}
 0x12d   : > { %545 = dma.vmem_to_hbm [thread:$0]  (%p897_p13), %s358_s9, 128, %s360_s28, %s980_s15  }
 0x12e   : > { %s276_s26 = scalar_lea.vmem [#allocation10], %s933_s27  ;;  %s373_s8 = sshll.u32 %s369_s17, 4  ;;  %s374_s8 = int_to_ptr.hbm [resolvable:$true] %s373_s8 }
 0x12f   : > { %s371_s24 = sshll.u32 %s276_s26, 4  ;;  %s740_s6 = sshra.s32 %s374_s8, 4  ;;  %s372_s24 = int_to_ptr.vmem [resolvable:$true] %s371_s24  ;;  %s741_s6 = int_to_ptr.hbm [resolvable:$true] %s740_s6 }
 0x130   : > { %s742_s29 = scalar_lea.hbm %s741_s6, 8  ;;  %s746_s13 = scalar_lea.hbm %s1031_s5, 16 }
 0x131   : > { %p743_p5 = scmp.ne.s32.totalorder %s741_s6, %s742_s29  ;;  %p747_p7 = scmp.lt.s32.totalorder %s741_s6, %s1031_s5 }
 0x132   : > { %v317_v9 = vpop.permute.xlu0 %316  ;;  %p748_p9 = scmp.lt.s32.totalorder %s746_s13, %s742_s29 }
 0x133   : > { %319 = vst.msk [vmem:[%s276_s26] sm:$0xff] %vm286_vm0, %v317_v9  ;;  %p744_p12 = pnand %p743_p5, %p897_p13 }
 0x134   : > { %p749_p10 = por %p748_p9, %p747_p7 }
 0x135   : > { %p745_p8 = pneg %p744_p12 }
 0x137   : > { %p750_p11 = pnand %p749_p10, %p745_p8 }
 0x139   : > { %753 = shalt.err (!%p750_p11)
}
 0x13a   : > { %546 = dma.vmem_to_hbm [thread:$0]  (%p897_p13), %s372_s24, 128, %s374_s8, %s980_s15  }
 0x13b PF: > { %s385_s28 = sand.u32 1, %s788_s18   ;;  %p1038_p0 = scmp.ge.s32.totalorder %s800_s21, 2 }
 0x13c   : > { %s386_s17 = scalar_lea.sflag [#allocation4], %s385_s28 }
 0x13d   : > { %p559_p2 = pnand %p1038_p0, %p904_p4 }
 0x13f   : > { %p560_p6 = pneg %p559_p2 }
 0x141   : > { %779 = dma.done.wait (%p560_p6), %s386_s17, 128  }
 0x142   : > { %781 = vsyncadd (%p560_p6), %s386_s17, 4294967168  ;;  %s1039_s25 = sadd.s32 4294967294, %s800_s21  }
 0x143   : > { %s395_s16 = sand.u32 1, %s1039_s25  }
 0x144   : > { %s396_s22 = scalar_lea.sflag [#allocation9], %s395_s16 }
 0x145   : > { %783 = dma.done.wait (%p560_p6), %s396_s22, 256  }
 0x146   : > { %785 = vsyncadd (%p560_p6), %s396_s22, 4294967040  ;;  %p23_p13 = scmp.ge.s32.totalorder %s877_s7, 4   ;;  %s1040_s18 = smov %s792_s19 }
 0x147   : > { %s1041_s19 = smov %s796_s20  ;;  %s1042_s20 = smov %s889_s10 }
 0x148   : > { %s1043_s21 = smov %s877_s7  ;;  %25 = sbr.rel (!%p23_p13) target bundleno = 8 (0x8), region = 113 }
 0x14d   :  { %412 = vsyncpa [#allocation3], 1 }
 0x14e   :  { %414 = vsyncpa [#allocation3 + $0x1], 1 }
 0x14f   :  { %415 = vsyncpa [#allocation6], 1 }
 0x150   :  { %416 = vsyncpa [#allocation4], 1 }
 0x151   :  { %418 = vsyncpa [#allocation4 + $0x1], 1 }
 0x152   :  { %419 = vsyncpa [#allocation9], 1 }
 0x153   :  { %421 = vsyncpa [#allocation9 + $0x1], 1 }

</bundles_post_ra>
